<compile_context>
chip_gen: v6e
topology: v6e:2x2x1
jax: 0.10.0
libtpu: 0.0.40
codegen_flags: <defaults>
</compile_context>

<pallas_src>
import functools
import math

import jax
import jax.numpy as jnp
from jax.experimental import pallas as pl
from jax.experimental.pallas import tpu as pltpu


_TARGET_BLOCK_BYTES = 2 << 20      # ~2 MiB input block: 85-90% of HBM roofline
_MAX_FOLDED_LANES = 2048           # widest folded row we bother producing
_VMEM_LIMIT = 48 * 1024 * 1024     # safe on v5e/v6e (128 MiB) and v7x (64 MiB)


def _cdiv(a: int, b: int) -> int:
    return -(-a // b)


def _round_up(a: int, b: int) -> int:
    return _cdiv(a, b) * b


def _plan_rows(rows: int, row_bytes: int, sublane: int):
    """Pick (tile_rows, num_steps).

    tile_rows is a multiple of `sublane`, the block stays ~<= 2 MiB, and the
    number of grid steps is even whenever it is > 1 so the single "parallel"
    grid axis load-balances across v7x's two TensorCores.
    """
    budget_rows = max(
        sublane, (_TARGET_BLOCK_BYTES // max(row_bytes, 1)) // sublane * sublane)
    tile = min(_round_up(rows, sublane), budget_rows)
    steps = _cdiv(rows, tile)
    if steps == 1 and rows >= 2 * sublane and rows * row_bytes >= (1 << 20):
        # Medium sizes: split once so pipelining + megacore have work to share.
        steps = 2
        tile = _round_up(_cdiv(rows, steps), sublane)
        steps = _cdiv(rows, tile)
    if steps > 1 and steps % 2:
        t2 = _round_up(_cdiv(rows, steps + 1), sublane)
        if _cdiv(rows, t2) == steps + 1:
            tile, steps = t2, steps + 1
    return tile, steps


def _pad_rows(x: jax.Array, rows_needed: int) -> jax.Array:
    """Pad the batch dimension with ones (finite, harmless; sliced away)."""
    pad = rows_needed - x.shape[0]
    if pad == 0:
        return x
    return jnp.concatenate([x, jnp.ones((pad, x.shape[1]), x.dtype)], axis=0)


# --------------------------------------------------------------------------
# Kernels
# --------------------------------------------------------------------------
def _direct_kernel(x_ref, o_ref):
    """One logical row per VMEM row (R already lane-dense, or too wide to fold)."""
    x = x_ref[...].astype(jnp.float32)
    s = jnp.sum(x, axis=-1, keepdims=True)
    inv = 1.0 / s                       # (tile, 1): R x fewer divides than x / s
    # A zero row-sum gives inf here, so x * inf reproduces PyTorch's inf/nan.
    o_ref[...] = (x * inv).astype(o_ref.dtype)


def _dot_split(v, m, terms):
    """v @ m with the f32 operand `v` split into `terms` bf16 components.

    Products against the 0/1 matrix `m` are exact and accumulate in f32, so
    3 terms give >= 24 mantissa bits of accuracy independent of how the
    backend would lower an f32 matmul.
    """
    hi = v.astype(jnp.bfloat16)
    acc = jnp.dot(hi, m, preferred_element_type=jnp.float32)
    if terms >= 2:
        r = v - hi.astype(jnp.float32)
        mid = r.astype(jnp.bfloat16)
        acc = acc + jnp.dot(mid, m, preferred_element_type=jnp.float32)
        if terms >= 3:
            lo = (r - mid.astype(jnp.float32)).astype(jnp.bfloat16)
            acc = acc + jnp.dot(lo, m, preferred_element_type=jnp.float32)
    return acc


def _folded_kernel(x_ref, o_ref, *, rules: int, fold: int):
    """Lane-dense path: each row holds `fold` logical rows of `rules` rules."""
    R, k = rules, fold
    C = R * k
    kp = max(k, 8)   # pad the tiny segment axis; dummy segments are masked out

    x = x_ref[...]

    # 0/1 reduce (C, kp) and expand (kp, C) matrices built from iotas in-kernel
    # (no HBM stream, no integer division).  Columns/rows j >= k are all-zero.
    c_r = jax.lax.broadcasted_iota(jnp.int32, (C, kp), 0)
    j_r = jax.lax.broadcasted_iota(jnp.int32, (C, kp), 1) * R
    m_reduce = jnp.where((c_r >= j_r) & (c_r < j_r + R), 1.0, 0.0
                         ).astype(jnp.bfloat16)
    j_e = jax.lax.broadcasted_iota(jnp.int32, (kp, C), 0) * R
    c_e = jax.lax.broadcasted_iota(jnp.int32, (kp, C), 1)
    m_expand = jnp.where((c_e >= j_e) & (c_e < j_e + R), 1.0, 0.0
                         ).astype(jnp.bfloat16)

    # Per-logical-row sums on the MXU.
    if x.dtype == jnp.bfloat16:
        xf = x.astype(jnp.float32)
        seg = jnp.dot(x, m_reduce, preferred_element_type=jnp.float32)
        exp_terms = 2          # 16-bit denominator >> bf16 output precision
    else:
        xf = x.astype(jnp.float32)
        seg = _dot_split(xf, m_reduce, 3)
        exp_terms = 3

    # Exact reciprocal on the tiny (tile, kp) array.  Non-finite values (dead
    # segments and dummy padding columns) are zeroed so the expand matmul never
    # sees inf * 0 = nan.
    inv = 1.0 / seg
    inv = jnp.where(jnp.isfinite(inv), inv, 0.0)

    # Expand the per-segment reciprocal back to all C lanes.
    inv_e = _dot_split(inv, m_expand, exp_terms)

    # Dead logical rows (segment sum == 0) ended up with inv_e == 0 exactly;
    # multiply by inf there so the output is +-inf / nan like PyTorch's x / 0.
    inv_e = jnp.where(inv_e == 0.0, jnp.inf, inv_e)

    o_ref[...] = (xf * inv_e).astype(o_ref.dtype)


# --------------------------------------------------------------------------
# Wrapper
# --------------------------------------------------------------------------
def anfis_rule_strength_normalization(x: jax.Array) -> jax.Array:
    """out = x / sum(x, axis=1, keepdims=True) for x of shape (batch, num_rules)."""
    if x.ndim != 2:
        raise ValueError("expected (batch, num_rules)")
    B, R = x.shape
    dtype = x.dtype
    itemsize = jnp.dtype(dtype).itemsize
    sublane = 16 if itemsize == 2 else 8
    compiler_params = pltpu.CompilerParams(
        dimension_semantics=("parallel",),
        vmem_limit_bytes=_VMEM_LIMIT,
    )

    lane_fold = 128 // math.gcd(R, 128)        # logical rows per lane-dense row
    C = lane_fold * R                          # folded row width (multiple of 128)
    use_fold = lane_fold > 1 and C <= _MAX_FOLDED_LANES

    if not use_fold:
        # R is already a multiple of 128 (lane dense as-is) or too wide to be
        # worth folding: tile the batch and reduce over the lane axis.
        tile, steps = _plan_rows(B, R * itemsize, sublane)
        B_p = tile * steps
        x_in = _pad_rows(x, B_p)
        cost = pl.CostEstimate(flops=3 * B_p * R, transcendentals=0,
                               bytes_accessed=2 * B_p * R * itemsize)
        out = pl.pallas_call(
            _direct_kernel,
            out_shape=jax.ShapeDtypeStruct((B_p, R), dtype),
            grid=(steps,),
            in_specs=[pl.BlockSpec((tile, R), lambda i: (i, 0))],
            out_specs=pl.BlockSpec((tile, R), lambda i: (i, 0)),
            compiler_params=compiler_params,
            cost_estimate=cost,
        )(x_in)
        return out if B_p == B else out[:B]

    # Lane-dense folded path.
    rows = _cdiv(B, lane_fold)
    tile, steps = _plan_rows(rows, C * itemsize, sublane)
    rows_p = tile * steps
    B_p = rows_p * lane_fold
    x_in = _pad_rows(x, B_p).reshape(rows_p, C)        # free row-major reshape
    n_mm = 3 if dtype == jnp.bfloat16 else 6           # reduce + expand passes
    cost = pl.CostEstimate(
        flops=rows_p * (2 * n_mm * C * max(lane_fold, 8) + 4 * C),
        transcendentals=0,
        bytes_accessed=2 * rows_p * C * itemsize,
    )
    kernel = functools.partial(_folded_kernel, rules=R, fold=lane_fold)
    out = pl.pallas_call(
        kernel,
        out_shape=jax.ShapeDtypeStruct((rows_p, C), dtype),
        grid=(steps,),
        in_specs=[pl.BlockSpec((tile, C), lambda i: (i, 0))],
        out_specs=pl.BlockSpec((tile, C), lambda i: (i, 0)),
        compiler_params=compiler_params,
        cost_estimate=cost,
    )(x_in)
    out = out.reshape(B_p, R)
    return out if B_p == B else out[:B]


def _reference(x):
    x32 = x.astype(jnp.float32)
    s = jnp.sum(x32, axis=1, keepdims=True)
    return x32 / s


if __name__ == "__main__":
    key = jax.random.PRNGKey(0)
    k1, k2, k3, k4 = jax.random.split(key, 4)

    # Typical ANFIS sizes (R << 128): lane-dense folded path, fold = 8.
    B, R = 256, 16
    x = jax.random.uniform(k1, (B, R), dtype=jnp.float32, minval=0.1, maxval=1.0)
    out = jax.block_until_ready(anfis_rule_strength_normalization(x))
    assert out.shape == (B, R) and out.dtype == x.dtype
    assert jnp.allclose(out, _reference(x), rtol=1e-5, atol=1e-6), \
        "folded f32 path mismatch"

    # Batch not divisible by the fold + tiny odd R: exercises ones-padding and
    # fold = 128 (C = 640).
    B2, R2 = 100, 5
    x2 = jax.random.uniform(k2, (B2, R2), dtype=jnp.float32, minval=0.1, maxval=1.0)
    out2 = jax.block_until_ready(anfis_rule_strength_normalization(x2))
    assert out2.shape == (B2, R2)
    assert jnp.allclose(out2, _reference(x2), rtol=1e-5, atol=1e-6), \
        "padded folded path mismatch"

    # fold = 4 (< 8): exercises the padded/dummy segment columns.
    B3, R3 = 64, 32
    x3 = jax.random.uniform(k3, (B3, R3), dtype=jnp.float32, minval=0.1, maxval=1.0)
    out3 = jax.block_until_ready(anfis_rule_strength_normalization(x3))
    assert jnp.allclose(out3, _reference(x3), rtol=1e-5, atol=1e-6), \
        "small-fold path mismatch"

    # R a multiple of 128: direct lane-dense row-reduce path (with row padding).
    B4, R4 = 50, 128
    x4 = jax.random.uniform(k4, (B4, R4), dtype=jnp.float32, minval=0.1, maxval=1.0)
    out4 = jax.block_until_ready(anfis_rule_strength_normalization(x4))
    assert jnp.allclose(out4, _reference(x4), rtol=1e-5, atol=1e-6), \
        "direct path mismatch"

    # bf16 I/O (halves HBM traffic; removes the in-kernel 3-way split).
    xb = x.astype(jnp.bfloat16)
    outb = jax.block_until_ready(anfis_rule_strength_normalization(xb))
    assert outb.dtype == jnp.bfloat16
    assert jnp.allclose(outb.astype(jnp.float32), _reference(xb),
                        rtol=5e-3, atol=5e-3), "folded bf16 path mismatch"

    print("KERNEL_OK")
</pallas_src>

<mosaic_0001>
module attributes {stable_mosaic.version = 11 : i64} {
  func.func @_folded_kernel(%arg0: i32, %arg1: memref<32x128xf32, #tpu.memory_space<vmem>>, %arg2: memref<32x128xf32, #tpu.memory_space<vmem>>) attributes {dimension_semantics = [#tpu.dimension_semantics<parallel>], iteration_bounds = array<i64: 1>, scalar_prefetch = 0 : i64, scratch_operands = 0 : i64, tpu.core_type = #tpu.core_type<tc>, window_params = [{transform_indices = @transform_0, window_bounds = array<i64: 32, 128>}, {transform_indices = @transform_1, window_bounds = array<i64: 32, 128>}]} {
    %c0 = arith.constant 0 : index
    %c0_0 = arith.constant 0 : index
    %0 = vector.load %arg1[%c0, %c0_0] : memref<32x128xf32, #tpu.memory_space<vmem>>, vector<32x128xf32>
    %1 = tpu.iota {dimensions = array<i32: 0>} : vector<128x8xi32>
    %2 = tpu.iota {dimensions = array<i32: 1>} : vector<128x8xi32>
    %c16_i32 = arith.constant 16 : i32
    %3 = vector.broadcast %c16_i32 : i32 to vector<128x8xi32>
    %4 = arith.muli %2, %3 : vector<128x8xi32>
    %5 = arith.cmpi sge, %1, %4 : vector<128x8xi32>
    %c16_i32_1 = arith.constant 16 : i32
    %6 = vector.broadcast %c16_i32_1 : i32 to vector<128x8xi32>
    %7 = arith.addi %4, %6 : vector<128x8xi32>
    %8 = arith.cmpi slt, %1, %7 : vector<128x8xi32>
    %9 = arith.andi %5, %8 : vector<128x8xi1>
    %cst = arith.constant 1.000000e+00 : f32
    %cst_2 = arith.constant 0.000000e+00 : f32
    %10 = vector.broadcast %cst : f32 to vector<128x8xf32>
    %11 = vector.broadcast %cst_2 : f32 to vector<128x8xf32>
    %12 = arith.select %9, %10, %11 : vector<128x8xi1>, vector<128x8xf32>
    %13 = arith.truncf %12 : vector<128x8xf32> to vector<128x8xbf16>
    %14 = tpu.iota {dimensions = array<i32: 0>} : vector<8x128xi32>
    %c16_i32_3 = arith.constant 16 : i32
    %15 = vector.broadcast %c16_i32_3 : i32 to vector<8x128xi32>
    %16 = arith.muli %14, %15 : vector<8x128xi32>
    %17 = tpu.iota {dimensions = array<i32: 1>} : vector<8x128xi32>
    %18 = arith.cmpi sge, %17, %16 : vector<8x128xi32>
    %c16_i32_4 = arith.constant 16 : i32
    %19 = vector.broadcast %c16_i32_4 : i32 to vector<8x128xi32>
    %20 = arith.addi %16, %19 : vector<8x128xi32>
    %21 = arith.cmpi slt, %17, %20 : vector<8x128xi32>
    %22 = arith.andi %18, %21 : vector<8x128xi1>
    %cst_5 = arith.constant 1.000000e+00 : f32
    %cst_6 = arith.constant 0.000000e+00 : f32
    %23 = vector.broadcast %cst_5 : f32 to vector<8x128xf32>
    %24 = vector.broadcast %cst_6 : f32 to vector<8x128xf32>
    %25 = arith.select %22, %23, %24 : vector<8x128xi1>, vector<8x128xf32>
    %26 = arith.truncf %25 : vector<8x128xf32> to vector<8x128xbf16>
    %27 = arith.truncf %0 : vector<32x128xf32> to vector<32x128xbf16>
    %cst_7 = arith.constant dense<0.000000e+00> : vector<32x8xf32>
    %28 = tpu.matmul %27, %13, %cst_7 {dimension_numbers = #tpu.dot_dimension_numbers<[1], [0], [0], [1], [0, 0, 1, 1], [], []>} : vector<32x128xbf16>, vector<128x8xbf16>, vector<32x8xf32> -> vector<32x8xf32>
    %29 = arith.extf %27 : vector<32x128xbf16> to vector<32x128xf32>
    %30 = arith.subf %0, %29 : vector<32x128xf32>
    %31 = arith.truncf %30 : vector<32x128xf32> to vector<32x128xbf16>
    %cst_8 = arith.constant dense<0.000000e+00> : vector<32x8xf32>
    %32 = tpu.matmul %31, %13, %cst_8 {dimension_numbers = #tpu.dot_dimension_numbers<[1], [0], [0], [1], [0, 0, 1, 1], [], []>} : vector<32x128xbf16>, vector<128x8xbf16>, vector<32x8xf32> -> vector<32x8xf32>
    %33 = arith.addf %28, %32 : vector<32x8xf32>
    %34 = arith.extf %31 : vector<32x128xbf16> to vector<32x128xf32>
    %35 = arith.subf %30, %34 : vector<32x128xf32>
    %36 = arith.truncf %35 : vector<32x128xf32> to vector<32x128xbf16>
    %cst_9 = arith.constant dense<0.000000e+00> : vector<32x8xf32>
    %37 = tpu.matmul %36, %13, %cst_9 {dimension_numbers = #tpu.dot_dimension_numbers<[1], [0], [0], [1], [0, 0, 1, 1], [], []>} : vector<32x128xbf16>, vector<128x8xbf16>, vector<32x8xf32> -> vector<32x8xf32>
    %38 = arith.addf %33, %37 : vector<32x8xf32>
    %cst_10 = arith.constant 1.000000e+00 : f32
    %39 = vector.broadcast %cst_10 : f32 to vector<32x8xf32>
    %40 = arith.divf %39, %38 : vector<32x8xf32>
    %41 = tpu.weird %40 : vector<32x8xf32> -> vector<32x8xi1>
    %cst_11 = arith.constant dense<true> : vector<32x8xi1>
    %42 = arith.xori %41, %cst_11 : vector<32x8xi1>
    %cst_12 = arith.constant 0.000000e+00 : f32
    %43 = vector.broadcast %cst_12 : f32 to vector<32x8xf32>
    %44 = arith.select %42, %40, %43 : vector<32x8xi1>, vector<32x8xf32>
    %45 = arith.truncf %44 : vector<32x8xf32> to vector<32x8xbf16>
    %cst_13 = arith.constant dense<0.000000e+00> : vector<32x128xf32>
    %46 = tpu.matmul %45, %26, %cst_13 {dimension_numbers = #tpu.dot_dimension_numbers<[1], [0], [0], [1], [0, 0, 1, 1], [], []>} : vector<32x8xbf16>, vector<8x128xbf16>, vector<32x128xf32> -> vector<32x128xf32>
    %47 = arith.extf %45 : vector<32x8xbf16> to vector<32x8xf32>
    %48 = arith.subf %44, %47 : vector<32x8xf32>
    %49 = arith.truncf %48 : vector<32x8xf32> to vector<32x8xbf16>
    %cst_14 = arith.constant dense<0.000000e+00> : vector<32x128xf32>
    %50 = tpu.matmul %49, %26, %cst_14 {dimension_numbers = #tpu.dot_dimension_numbers<[1], [0], [0], [1], [0, 0, 1, 1], [], []>} : vector<32x8xbf16>, vector<8x128xbf16>, vector<32x128xf32> -> vector<32x128xf32>
    %51 = arith.addf %46, %50 : vector<32x128xf32>
    %52 = arith.extf %49 : vector<32x8xbf16> to vector<32x8xf32>
    %53 = arith.subf %48, %52 : vector<32x8xf32>
    %54 = arith.truncf %53 : vector<32x8xf32> to vector<32x8xbf16>
    %cst_15 = arith.constant dense<0.000000e+00> : vector<32x128xf32>
    %55 = tpu.matmul %54, %26, %cst_15 {dimension_numbers = #tpu.dot_dimension_numbers<[1], [0], [0], [1], [0, 0, 1, 1], [], []>} : vector<32x8xbf16>, vector<8x128xbf16>, vector<32x128xf32> -> vector<32x128xf32>
    %56 = arith.addf %51, %55 : vector<32x128xf32>
    %cst_16 = arith.constant 0.000000e+00 : f32
    %57 = vector.broadcast %cst_16 : f32 to vector<32x128xf32>
    %58 = arith.cmpf oeq, %56, %57 : vector<32x128xf32>
    %cst_17 = arith.constant 0x7F800000 : f32
    %59 = vector.broadcast %cst_17 : f32 to vector<32x128xf32>
    %60 = arith.select %58, %59, %56 : vector<32x128xi1>, vector<32x128xf32>
    %61 = arith.mulf %0, %60 : vector<32x128xf32>
    %c0_18 = arith.constant 0 : index
    %c0_19 = arith.constant 0 : index
    %62 = vector.load %arg2[%c0_18, %c0_19] : memref<32x128xf32, #tpu.memory_space<vmem>>, vector<32x128xf32>
    tpu.vector_store %arg2[%c0_18, %c0_19], %61 {strides = array<i32>} : memref<32x128xf32, #tpu.memory_space<vmem>>, vector<32x128xf32>,
    return
  }
  func.func @transform_0(%arg0: i32) -> (i32, i32) {
    %c0_i32 = arith.constant 0 : i32
    %c0_i32_0 = arith.constant 0 : i32
    return %arg0, %c0_i32 : i32, i32
  }
  func.func @transform_1(%arg0: i32) -> (i32, i32) {
    %c0_i32 = arith.constant 0 : i32
    %c0_i32_0 = arith.constant 0 : i32
    return %arg0, %c0_i32 : i32, i32
  }
}

</mosaic_0001>

<bundles_post_ra>
// kernel: tpu_custom_call.1
= control target key start
LH: loop header
LB: loop body
LE: loop exit
PB: predicated region body
PF: predicated region fallthrough
CT: control target
= control target key end

     0   :  { %6 = vsyncpa [#allocation3], 0  ;;  %s1095_s0 = inlined_call_operand.hbm [shape: f32[32,128], index: 0, kind: input, shape index: {}]   ;;  %s1096_s1 = inlined_call_operand.hbm [shape: f32[32,128], index: 1, kind: output, shape index: {}]  }
   0x1   :  { %7 = vsyncpa [#allocation4], 0  ;;  %s783_s6 = smov [#allocation2]  }
   0x2   :  { %s13_s7 = sshll.u32 %s783_s6, 4  ;;  %s14_s7 = int_to_ptr.vmem [resolvable:$true] %s13_s7 }
   0x3   :  { %s747_s8 = scalar_lea.vmem %s14_s7, 512  ;;  %p752_p1 = scmp.lt.s32.totalorder %s14_s7, %s14_s7 }
   0x4   :  { %p748_p0 = scmp.ne.s32.totalorder %s14_s7, %s747_s8  ;;  %p753_p2 = scmp.lt.s32.totalorder %s747_s8, %s747_s8 }
   0x6   :  { %p754_p3 = por %p753_p2, %p752_p1 }
   0x8   :  { %p755_p4 = pnand %p754_p3, %p748_p0 }
   0xa   :  { %758 = shalt.err (!%p755_p4)
}
   0xb   :  { %s784_s9 = smov 128   ;;  %s785_s10 = smov 8   ;;  %v28_v0 = vlaneseq }
   0xc   :  { %19 = dma.hbm_to_vmem [thread:$0]  %s1095_s0, 512, %s14_s7, [#allocation3], %s784_s9, %s784_s9, %s785_s10  }
   0xd   :  { %779 = dma.done.wait [#allocation3], 512  }
   0xe   :  { %780 = vsyncadd [#allocation3], 4294966784  ;;  %v806_v1 = vshrl.u32 %v28_v0, 7  ;;  %v808_v2 = vand.u32 127, %v28_v0  ;;  %v786_v13 = vmov 1.0|1.0  }
   0xf   :  { %v852_v15 = vld [vmem:[#allocation2] sm:$0xff]  ;;  %v854_v16 = vld [vmem:[#allocation2 + $0x8] sm:$0xff]  ;;  %v939_v34 = vld [vmem:[#allocation2 + $0x10] sm:$0xff]  ;;  %v787_v57 = vmov 0.0   ;;  %s789_s0 = smov [#allocation5]  }
  0x10   :  { %v43_v3 = vadd.s32 112, %v806_v1  ;;  %v44_v4 = vadd.s32 120, %v806_v1  ;;  %v813_v5 = vmul.u32 16, %v808_v2  ;;  %v41_v6 = vadd.s32 96, %v806_v1  ;;  %v941_v35 = vld [vmem:[#allocation2 + $0x18] sm:$0xff]  ;;  %s538_s13 = sshll.u32 %s789_s0, 4  ;;  %s539_s13 = int_to_ptr.vmem [resolvable:$true] %s538_s13 }
  0x11   :  { %v42_v8 = vadd.s32 104, %v806_v1  ;;  %v39_v9 = vadd.s32 80, %v806_v1  ;;  %v40_v10 = vadd.s32 88, %v806_v1  ;;  %v37_v12 = vadd.s32 64, %v806_v1  ;;  %s759_s14 = scalar_lea.vmem %s539_s13, 512  ;;  %p764_p6 = scmp.lt.s32.totalorder %s539_s13, %s539_s13 }
  0x12   :  { %vm62_vm0 = vcmp.ge.s32.totalorder %v43_v3, %v813_v5  ;;  %v818_v7 = vadd.s32 16, %v813_v5  ;;  %vm63_vm1 = vcmp.ge.s32.totalorder %v44_v4, %v813_v5  ;;  %vm60_vm5 = vcmp.ge.s32.totalorder %v41_v6, %v813_v5  ;;  %p760_p5 = scmp.ne.s32.totalorder %s539_s13, %s759_s14  ;;  %p765_p7 = scmp.lt.s32.totalorder %s759_s14, %s759_s14 }
  0x13   :  { %vm61_vm8 = vcmp.ge.s32.totalorder %v42_v8, %v813_v5  ;;  %vm58_vm12 = vcmp.ge.s32.totalorder %v39_v9, %v813_v5  ;;  %v38_v14 = vadd.s32 72, %v806_v1  ;;  %vm59_vm15 = vcmp.ge.s32.totalorder %v40_v10, %v813_v5 }
  0x14   :  { %vm79_vm2 = vcmp.lt.s32.totalorder %v43_v3, %v818_v7  ;;  %vm80_vm3 = vcmp.lt.s32.totalorder %v44_v4, %v818_v7  ;;  %vm77_vm6 = vcmp.lt.s32.totalorder %v41_v6, %v818_v7  ;;  %vm78_vm9 = vcmp.lt.s32.totalorder %v42_v8, %v818_v7  ;;  %p766_p8 = por %p765_p7, %p764_p6 }
  0x15   :  { %vm95_vm4 = vmand %vm62_vm0, %vm79_vm2  ;;  %vm75_vm13 = vcmp.lt.s32.totalorder %v39_v9, %v818_v7  ;;  %vm76_vm0 = vcmp.lt.s32.totalorder %v40_v10, %v818_v7  ;;  %v35_v18 = vadd.s32 48, %v806_v1  ;;  %v36_v19 = vadd.s32 56, %v806_v1 }
  0x16   :  { %vm96_vm7 = vmand %vm63_vm1, %vm80_vm3  ;;  %vm56_vm3 = vcmp.ge.s32.totalorder %v37_v12, %v813_v5  ;;  %v128_v20 = vpack.c.bf16 %v854_v16, %v852_v15  ;;  %v33_v22 = vadd.s32 32, %v806_v1  ;;  %v34_v23 = vadd.s32 40, %v806_v1  ;;  %p767_p9 = pnand %p766_p8, %p760_p5 }
  0x17   :  { %vm830_vm10 = vmpackc.low %vm96_vm7, %vm95_vm4  ;;  %vm73_vm4 = vcmp.lt.s32.totalorder %v37_v12, %v818_v7  ;;  %vm74_vm7 = vcmp.lt.s32.totalorder %v38_v14, %v818_v7  ;;  %v31_v27 = vadd.s32 16, %v806_v1  ;;  %v32_v30 = vadd.s32 24, %v806_v1 }
  0x18   :  { %643 = vmatprep.subr.msk.bf16.mxu0 %vm830_vm10, %v786_v13  ;;  %663 = vmatprep.subr.msk.bf16.mxu1 %vm830_vm10, %v786_v13  ;;  %vm93_vm11 = vmand %vm60_vm5, %vm77_vm6  ;;  %vm57_vm6 = vcmp.ge.s32.totalorder %v38_v14, %v813_v5  ;;  %v130_v24 = vunpack.c.l.bf16 %v128_v20  ;;  %v131_v25 = vunpack.c.h.bf16 %v128_v20  ;;  %v30_v33 = vadd.s32 8, %v806_v1 }
  0x19   :  { %644 = vmatpush3.bf16.msk.msra.mxu0 %vm830_vm10, %v786_v13  ;;  %664 = vmatpush3.bf16.msk.msra.mxu1 %vm830_vm10, %v786_v13  ;;  %vm94_vm14 = vmand %vm61_vm8, %vm78_vm9  ;;  %v129_v37 = vpack.c.bf16 %v941_v35, %v939_v34  ;;  %v121_v55 = vmul.u32 16, %v806_v1 }
  0x1a   :  { %vm856_vm1 = vmpackc.low %vm94_vm14, %vm93_vm11  ;;  %vm54_vm11 = vcmp.ge.s32.totalorder %v35_v18, %v813_v5  ;;  %vm55_vm14 = vcmp.ge.s32.totalorder %v36_v19, %v813_v5  ;;  %679 = vmatprep.mubr.bf16.mxu1 %v128_v20  ;;  %v134_v28 = vsub.f32 %v852_v15, %v130_v24  ;;  %v135_v29 = vsub.f32 %v854_v16, %v131_v25 }
  0x1b   :  { %645 = vmatprep.subr.msk.bf16.mxu0 %vm856_vm1, %v786_v13  ;;  %665 = vmatprep.subr.msk.bf16.mxu1 %vm856_vm1, %v786_v13  ;;  %vm91_vm2 = vmand %vm58_vm12, %vm75_vm13  ;;  %vm71_vm12 = vcmp.lt.s32.totalorder %v35_v18, %v818_v7  ;;  %v132_v39 = vunpack.c.l.bf16 %v129_v37  ;;  %v133_v40 = vunpack.c.h.bf16 %v129_v37  ;;  %v123_v56 = vadd.s32 16, %v121_v55 }
  0x1c   :  { %vm92_vm5 = vmand %vm59_vm15, %vm76_vm0  ;;  %vm72_vm15 = vcmp.lt.s32.totalorder %v36_v19, %v818_v7  ;;  %v138_v31 = vpack.c.bf16 %v135_v29, %v134_v28 }
  0x1d   :  { %646 = vmatpush3.bf16.msk.msra.mxu0 %vm856_vm1, %v786_v13  ;;  %666 = vmatpush3.bf16.msk.msra.mxu1 %vm856_vm1, %v786_v13  ;;  %vm880_vm8 = vmpackc.low %vm92_vm5, %vm91_vm2  ;;  %v136_v44 = vsub.f32 %v939_v34, %v132_v39  ;;  %v137_v45 = vsub.f32 %v941_v35, %v133_v40 }
  0x1e   :  { %647 = vmatprep.subr.msk.bf16.mxu0 %vm880_vm8, %v786_v13  ;;  %667 = vmatprep.subr.msk.bf16.mxu1 %vm880_vm8, %v786_v13  ;;  %vm89_vm9 = vmand %vm56_vm3, %vm73_vm4  ;;  %vm52_vm3 = vcmp.ge.s32.totalorder %v33_v22, %v813_v5  ;;  %vm69_vm4 = vcmp.lt.s32.totalorder %v33_v22, %v818_v7  ;;  %v238_v41 = vunpack.c.l.bf16 %v138_v31  ;;  %v239_v42 = vunpack.c.h.bf16 %v138_v31 }
  0x1f   :  { %vm90_vm13 = vmand %vm57_vm6, %vm74_vm7  ;;  %vm53_vm6 = vcmp.ge.s32.totalorder %v34_v23, %v813_v5  ;;  %vm70_vm7 = vcmp.lt.s32.totalorder %v34_v23, %v818_v7  ;;  %659 = vmatprep.mubr.bf16.mxu0 %v138_v31  ;;  %v139_v48 = vpack.c.bf16 %v137_v45, %v136_v44 }
  0x20   :  { %vm898_vm0 = vmpackc.low %vm90_vm13, %vm89_vm9  ;;  %vm67_vm13 = vcmp.lt.s32.totalorder %v31_v27, %v818_v7  ;;  %v242_v46 = vsub.f32 %v134_v28, %v238_v41  ;;  %v243_v47 = vsub.f32 %v135_v29, %v239_v42 }
  0x21   :  { %648 = vmatpush3.bf16.msk.msra.mxu0 %vm880_vm8, %v786_v13  ;;  %668 = vmatpush3.bf16.msk.msra.mxu1 %vm880_vm8, %v786_v13  ;;  %vm87_vm2 = vmand %vm54_vm11, %vm71_vm12  ;;  %vm50_vm12 = vcmp.ge.s32.totalorder %v31_v27, %v813_v5  ;;  %v240_v50 = vunpack.c.l.bf16 %v139_v48  ;;  %v241_v51 = vunpack.c.h.bf16 %v139_v48 }
  0x22   :  { %649 = vmatprep.subr.msk.bf16.mxu0 %vm898_vm0, %v786_v13  ;;  %669 = vmatprep.subr.msk.bf16.mxu1 %vm898_vm0, %v786_v13  ;;  %vm88_vm5 = vmand %vm55_vm14, %vm72_vm15  ;;  %vm51_vm15 = vcmp.ge.s32.totalorder %v32_v30, %v813_v5  ;;  %v246_v49 = vpack.c.bf16 %v243_v47, %v242_v46 }
  0x23   :  { %vm924_vm9 = vmpackc.low %vm88_vm5, %vm87_vm2  ;;  %vm68_vm2 = vcmp.lt.s32.totalorder %v32_v30, %v818_v7  ;;  %v244_v52 = vsub.f32 %v136_v44, %v240_v50  ;;  %v245_v53 = vsub.f32 %v137_v45, %v241_v51 }
  0x24   :  { %vm85_vm11 = vmand %vm52_vm3, %vm69_vm4 }
  0x25   :  { %650 = vmatpush3.bf16.msk.msra.mxu0 %vm898_vm0, %v786_v13  ;;  %670 = vmatpush3.bf16.msk.msra.mxu1 %vm898_vm0, %v786_v13  ;;  %vm86_vm14 = vmand %vm53_vm6, %vm70_vm7  ;;  %vm48_vm6 = vcmp.ge.s32.totalorder %v806_v1, %v813_v5  ;;  %vm65_vm7 = vcmp.lt.s32.totalorder %v806_v1, %v818_v7  ;;  %v247_v54 = vpack.c.bf16 %v245_v53, %v244_v52 }
  0x26   :  { %651 = vmatprep.subr.msk.bf16.mxu0 %vm924_vm9, %v786_v13  ;;  %671 = vmatprep.subr.msk.bf16.mxu1 %vm924_vm9, %v786_v13  ;;  %vm949_vm3 = vmpackc.low %vm86_vm14, %vm85_vm11  ;;  %vm49_vm11 = vcmp.ge.s32.totalorder %v30_v33, %v813_v5 }
  0x27   :  { %vm83_vm4 = vmand %vm50_vm12, %vm67_vm13  ;;  %vm66_vm12 = vcmp.lt.s32.totalorder %v30_v33, %v818_v7 }
  0x28   :  { %vm84_vm5 = vmand %vm51_vm15, %vm68_vm2 }
  0x29   :  { %652 = vmatpush3.bf16.msk.msra.mxu0 %vm924_vm9, %v786_v13  ;;  %672 = vmatpush3.bf16.msk.msra.mxu1 %vm924_vm9, %v786_v13  ;;  %vm973_vm13 = vmpackc.low %vm84_vm5, %vm83_vm4  ;;  %vm788_vm4 = vmmov 1  }
  0x2a   :  { %653 = vmatprep.subr.msk.bf16.mxu0 %vm949_vm3, %v786_v13  ;;  %673 = vmatprep.subr.msk.bf16.mxu1 %vm949_vm3, %v786_v13  ;;  %vm81_vm14 = vmand %vm48_vm6, %vm65_vm7 }
  0x2b   :  { %vm82_vm15 = vmand %vm49_vm11, %vm66_vm12 }
  0x2c   :  { %vm989_vm2 = vmpackc.low %vm82_vm15, %vm81_vm14  ;;  %vm333_vm14 = vcmask 64512  }
  0x2d   :  { %654 = vmatpush3.bf16.msk.msra.mxu0 %vm949_vm3, %v786_v13  ;;  %674 = vmatpush3.bf16.msk.msra.mxu1 %vm949_vm3, %v786_v13 }
  0x2e   :  { %655 = vmatprep.subr.msk.bf16.mxu0 %vm973_vm13, %v786_v13  ;;  %675 = vmatprep.subr.msk.bf16.mxu1 %vm973_vm13, %v786_v13 }
  0x31   :  { %656 = vmatpush3.bf16.msk.msra.mxu0 %vm973_vm13, %v786_v13  ;;  %676 = vmatpush3.bf16.msk.msra.mxu1 %vm973_vm13, %v786_v13 }
  0x32   :  { %657 = vmatprep.subr.msk.bf16.mxu0 %vm989_vm2, %v786_v13  ;;  %677 = vmatprep.subr.msk.bf16.mxu1 %vm989_vm2, %v786_v13 }
  0x35   :  { %658 = vmatpush3.bf16.msk.msra.mxu0 %vm989_vm2, %v786_v13  ;;  %678 = vmatpush3.bf16.msk.msra.mxu1 %vm989_vm2, %v786_v13 }
  0x36   :  { %683 = vmatprep.subr.msk.bf16.mxu0 %vm830_vm10, %v786_v13 }
  0x38   :  { %660 = vmatmul.mubr.bf16.vlgmr.msra.gmra.mxu0 %v139_v48  ;;  %680 = vmatmul.mubr.bf16.vlgmr.msra.gmra.mxu1 %v129_v37 }
  0x39   :  { %684 = vmatpush3.bf16.msk.msra.mxu0 %vm830_vm10, %v786_v13  ;;  %699 = vmatprep.mubr.bf16.mxu0 %v246_v49  ;;  %vm122_vm10 = vcmp.ge.s32.totalorder %v808_v2, %v121_v55 }
  0x3a   :  { %685 = vmatprep.subr.msk.bf16.mxu0 %vm856_vm1, %v786_v13 }
  0x3d   :  { %686 = vmatpush3.bf16.msk.msra.mxu0 %vm856_vm1, %v786_v13  ;;  %vm124_vm1 = vcmp.lt.s32.totalorder %v808_v2, %v123_v56 }
  0x3e   :  { %687 = vmatprep.subr.msk.bf16.mxu0 %vm880_vm8, %v786_v13 }
  0x41   :  { %688 = vmatpush3.bf16.msk.msra.mxu0 %vm880_vm8, %v786_v13  ;;  %vm125_vm8 = vmand %vm122_vm10, %vm124_vm1 }
  0x42   :  { %689 = vmatprep.subr.msk.bf16.mxu0 %vm898_vm0, %v786_v13  ;;  %v126_v58 = vsel %vm125_vm8, 1.0, %v787_v57 }
  0x43   :  { %v1064_v59 = vpack.c.bf16 %v126_v58, %v126_v58 }
  0x45   :  { %690 = vmatpush3.bf16.msk.msra.mxu0 %vm898_vm0, %v786_v13  ;;  %vm340_vm0 = vcmask 1043456  }
  0x46   :  { %691 = vmatprep.subr.msk.bf16.mxu0 %vm924_vm9, %v786_v13  ;;  %721 = vmatprep.subr.msk.bf16.mxu1 %vm340_vm0, %v1064_v59  ;;  %v1070_v60 = vsel %vm340_vm0, %v1064_v59, 0 }
  0x47   :  { %704 = vmatpush3.bf16.msra.mxu1 %v1070_v60 }
  0x48   :  { %722 = vmatprep.subr.msk.bf16.mxu1 %vm340_vm0, %v1064_v59 }
  0x49   :  { %692 = vmatpush3.bf16.msk.msra.mxu0 %vm924_vm9, %v786_v13 }
  0x4a   :  { %693 = vmatprep.subr.msk.bf16.mxu0 %vm949_vm3, %v786_v13 }
  0x4d   :  { %694 = vmatpush3.bf16.msk.msra.mxu0 %vm949_vm3, %v786_v13 }
  0x4e   :  { %695 = vmatprep.subr.msk.bf16.mxu0 %vm973_vm13, %v786_v13 }
  0x51   :  { %696 = vmatpush3.bf16.msk.msra.mxu0 %vm973_vm13, %v786_v13 }
  0x52   :  { %697 = vmatprep.subr.msk.bf16.mxu0 %vm989_vm2, %v786_v13 }
  0x55   :  { %698 = vmatpush3.bf16.msk.msra.mxu0 %vm989_vm2, %v786_v13 }
  0x58   :  { %700 = vmatmul.mubr.bf16.vlgmr.msra.gmra.mxu0 %v247_v54 }
  0xf8   :  { %v661_v61 = vpop.f32.mrf.mxu0  ;;  %v681_v62 = vpop.f32.mrf.mxu1 }
  0xf9   :  { %v232_v4 = vadd.f32 %v681_v62, %v661_v61 }
  0xfa   :  { %v174_v63 = vpop.f32.mrf.mxu0  ;;  %v223_v0 = vpop.f32.mrf.mxu1 }
  0xfb   :  { %v224_v6 = vadd.f32 %v223_v0, %v174_v63 }
  0xfc   :  { %v662_v1 = vpop.f32.mrf.mxu0  ;;  %v682_v2 = vpop.f32.mrf.mxu1 }
  0xfd   :  { %v235_v10 = vadd.f32 %v682_v2, %v662_v1 }
  0xfe   :  { %v177_v3 = vpop.f32.mrf.mxu0  ;;  %v226_v8 = vpop.f32.mrf.mxu1 }
  0xff   :  { %v227_v13 = vadd.f32 %v226_v8, %v177_v3 }
 0x118   :  { %v701_v5 = vpop.f32.mrf.mxu0 }
 0x119   :  { %v299_v7 = vadd.f32 %v701_v5, %v232_v4 }
 0x11a   :  { %v282_v9 = vpop.f32.mrf.mxu0 }
 0x11b   :  { %731 = vrcp.f32 %v299_v7  ;;  %v297_v11 = vadd.f32 %v282_v9, %v224_v6 }
 0x11c   :  { %v702_v12 = vpop.f32.mrf.mxu0 }
 0x11d   :  { %733 = vrcp.f32 %v297_v11  ;;  %v300_v14 = vadd.f32 %v702_v12, %v235_v10 }
 0x11e   :  { %v285_v17 = vpop.f32.mrf.mxu0 }
 0x11f   :  { %735 = vrcp.f32 %v300_v14  ;;  %v298_v18 = vadd.f32 %v285_v17, %v227_v13 }
 0x121   :  { %737 = vrcp.f32 %v298_v18 }
 0x128   :  { %v732_v19 = vpop.eup %731 }
 0x129   :  { %vm311_vm9 = vweird.f32 %v732_v19 }
 0x12a   :  { %v734_v20 = vpop.eup %733  ;;  %vm315_vm5 = vmxor %vm311_vm9, %vm788_vm4 }
 0x12b   :  { %vm309_vm3 = vweird.f32 %v734_v20  ;;  %v319_v23 = vsel %vm315_vm5, %v732_v19, 0.0 }
 0x12c   :  { %v736_v21 = vpop.eup %735  ;;  %vm313_vm7 = vmxor %vm309_vm3, %vm788_vm4 }
 0x12d   :  { %vm312_vm6 = vweird.f32 %v736_v21  ;;  %v317_v26 = vsel %vm313_vm7, %v734_v20, 0.0 }
 0x12e   :  { %v738_v22 = vpop.eup %737  ;;  %vm316_vm11 = vmxor %vm312_vm6, %vm788_vm4 }
 0x12f   :  { %vm310_vm12 = vweird.f32 %v738_v22  ;;  %v320_v24 = vsel %vm316_vm11, %v736_v21, 0.0 }
 0x130   :  { %vm314_vm13 = vmxor %vm310_vm12, %vm788_vm4  ;;  %v322_v25 = vpack.c.bf16 %v320_v24, %v319_v23 }
 0x131   :  { %v318_v27 = vsel %vm314_vm13, %v738_v22, 0.0 }
 0x132   :  { %v321_v28 = vpack.c.bf16 %v318_v27, %v317_v26  ;;  %v325_v29 = vunpack.c.l.bf16 %v322_v25  ;;  %v326_v30 = vunpack.c.h.bf16 %v322_v25 }
 0x134   :  { %v323_v31 = vunpack.c.l.bf16 %v321_v28  ;;  %v324_v32 = vunpack.c.h.bf16 %v321_v28  ;;  %v329_v33 = vsub.f32 %v319_v23, %v325_v29  ;;  %v330_v36 = vsub.f32 %v320_v24, %v326_v30 }
 0x136   :  { %v327_v37 = vsub.f32 %v317_v26, %v323_v31  ;;  %v328_v38 = vsub.f32 %v318_v27, %v324_v32  ;;  %v332_v40 = vpack.c.bf16 %v330_v36, %v329_v33 }
 0x138   :  { %v331_v39 = vpack.c.bf16 %v328_v38, %v327_v37  ;;  %v450_v45 = vunpack.c.l.bf16 %v332_v40  ;;  %v451_v46 = vunpack.c.h.bf16 %v332_v40 }
 0x13a   :  { %705 = vmatprep.mubr.msk.bf16.mxu1 %vm333_vm14, %v331_v39  ;;  %v448_v41 = vunpack.c.l.bf16 %v331_v39  ;;  %v449_v42 = vunpack.c.h.bf16 %v331_v39  ;;  %v454_v48 = vsub.f32 %v329_v33, %v450_v45  ;;  %v455_v49 = vsub.f32 %v330_v36, %v451_v46 }
 0x13b   :  { %706 = vmatmul.mubr.msk.bf16.vlgmr.msra.gmra.mxu1 %vm333_vm14, %v332_v40 }
 0x13c   :  { %710 = vmatpush3.bf16.msra.mxu1 %v1070_v60  ;;  %711 = vmatprep.mubr.msk.bf16.mxu1 %vm333_vm14, %v321_v28  ;;  %v452_v43 = vsub.f32 %v327_v37, %v448_v41  ;;  %v453_v44 = vsub.f32 %v328_v38, %v449_v42  ;;  %v457_v50 = vpack.c.bf16 %v455_v49, %v454_v48 }
 0x13d   :  { %723 = vmatprep.subr.msk.bf16.mxu1 %vm340_vm0, %v1064_v59 }
 0x13e   :  { %v456_v47 = vpack.c.bf16 %v453_v44, %v452_v43 }
 0x143   :  { %712 = vmatmul.mubr.msk.bf16.vlgmr.msra.gmra.mxu1 %vm333_vm14, %v322_v25 }
 0x144   :  { %716 = vmatpush3.bf16.msra.mxu1 %v1070_v60  ;;  %717 = vmatprep.mubr.msk.bf16.mxu1 %vm333_vm14, %v456_v47 }
 0x14b   :  { %718 = vmatmul.mubr.msk.bf16.vlgmr.msra.gmra.mxu1 %vm333_vm14, %v457_v50 }
 0x1fb   :  { %v707_v51 = vpop.f32.mrf.mxu1 }
 0x1fd   :  { %v378_v52 = vpop.f32.mrf.mxu1 }
 0x1ff   :  { %v708_v53 = vpop.f32.mrf.mxu1 }
 0x201   :  { %v381_v54 = vpop.f32.mrf.mxu1 }
 0x203   :  { %v713_v55 = vpop.f32.mrf.mxu1 }
 0x204   :  { %v442_v59 = vadd.f32 %v713_v55, %v707_v51 }
 0x205   :  { %v433_v56 = vpop.f32.mrf.mxu1 }
 0x206   :  { %v434_v62 = vadd.f32 %v433_v56, %v378_v52 }
 0x207   :  { %v714_v57 = vpop.f32.mrf.mxu1 }
 0x208   :  { %v445_v0 = vadd.f32 %v714_v57, %v708_v53 }
 0x209   :  { %v436_v58 = vpop.f32.mrf.mxu1 }
 0x20a   :  { %v437_v4 = vadd.f32 %v436_v58, %v381_v54 }
 0x20b   :  { %v719_v61 = vpop.f32.mrf.mxu1 }
 0x20c   :  { %v515_v63 = vadd.f32 %v719_v61, %v442_v59 }
 0x20d   :  { %v498_v60 = vpop.f32.mrf.mxu1 }
 0x20e   :  { %vm519_vm15 = vcmp.eq.f32.partialorder %v515_v63, 0.0  ;;  %v513_v1 = vadd.f32 %v498_v60, %v434_v62 }
 0x20f   :  { %v523_v2 = vsel %vm519_vm15, inf, %v515_v63  ;;  %v720_v3 = vpop.f32.mrf.mxu1 }
 0x210   :  { %v527_v5 = vmul.f32 %v523_v2, %v939_v34  ;;  %vm517_vm2 = vcmp.eq.f32.partialorder %v513_v1, 0.0  ;;  %v516_v6 = vadd.f32 %v720_v3, %v445_v0 }
 0x211   :  { %v521_v7 = vsel %vm517_vm2, inf, %v513_v1  ;;  %v501_v8 = vpop.f32.mrf.mxu1 }
 0x212   :  { %531 = vst [vmem:[#allocation5 + $0x10] sm:$0xff] %v527_v5  ;;  %v525_v9 = vmul.f32 %v521_v7, %v852_v15  ;;  %vm520_vm10 = vcmp.eq.f32.partialorder %v516_v6, 0.0  ;;  %v514_v10 = vadd.f32 %v501_v8, %v437_v4 }
 0x213   :  { %v524_v11 = vsel %vm520_vm10, inf, %v516_v6 }
 0x214   :  { %529 = vst [vmem:[#allocation5] sm:$0xff] %v525_v9  ;;  %v528_v12 = vmul.f32 %v524_v11, %v941_v35  ;;  %vm518_vm1 = vcmp.eq.f32.partialorder %v514_v10, 0.0 }
 0x215   :  { %v522_v13 = vsel %vm518_vm1, inf, %v514_v10 }
 0x216   :  { %532 = vst [vmem:[#allocation5 + $0x18] sm:$0xff] %v528_v12  ;;  %v526_v34 = vmul.f32 %v522_v13, %v854_v16 }
 0x218   :  { %530 = vst [vmem:[#allocation5 + $0x8] sm:$0xff] %v526_v34 }
 0x219   :  { %770 = shalt.err (!%p767_p9)
}
 0x21a   :  { %544 = dma.vmem_to_hbm [thread:$0]  %s539_s13, 512, %s1096_s1, [#allocation4], %s784_s9, %s784_s9, %s785_s10  }
 0x21b   :  { %781 = dma.done.wait [#allocation4], 512  }
 0x21c   :  { %782 = vsyncadd [#allocation4], 4294966784 }
 0x21d   :  { %548 = vsyncpa [#allocation3], 1 }
 0x21e   :  { %549 = vsyncpa [#allocation4], 1 }

</bundles_post_ra>
